<compile_context>
chip_gen: v5e
topology: v5e:2x2
jax: 0.10.0
libtpu: 0.0.40
codegen_flags: <defaults>
</compile_context>

<pallas_src>
import functools

import jax
import jax.numpy as jnp
from jax.experimental import pallas as pl
from jax.experimental.pallas import tpu as pltpu


def _round_up(x, m):
    return ((x + m - 1) // m) * m


# ---------------------------------------------------------------------------
# Phase 1: conv-as-matmul in lane-dense [Cout, tj] layout + per-tile partial
#          per-channel batch statistics (sum, sum of squares) from the f32
#          accumulator (the stored y itself is bf16).
# ---------------------------------------------------------------------------
def _conv_stats_kernel(at_ref, wt_ref, y_ref, sum_ref, sq_ref):
    # wT: [Cout, K] bf16  x  aT: [K, tj] bf16  ->  y: [Cout, tj] (f32 MXU acc).
    y = jnp.dot(wt_ref[...], at_ref[...], preferred_element_type=jnp.float32)
    # Partial stats for this tile (cross-lane reduce -> [Cout, 1], f32).
    sum_ref[...] = jnp.sum(y, axis=1, keepdims=True)
    sq_ref[...] = jnp.sum(y * y, axis=1, keepdims=True)
    # Intermediate activations stored bf16 (halves HBM write + re-read).
    y_ref[...] = y.astype(y_ref.dtype)


# ---------------------------------------------------------------------------
# Phase 2: in-kernel stats finalize + folded BN (y*scale + shift) + SiLU +
#          the `deploy` epilogue: sigmoid where w-index >= 4 (precomputed mask).
# ---------------------------------------------------------------------------
def _bn_silu_deploy_kernel(y_ref, psum_ref, psq_ref, gamma_ref, beta_ref,
                           mask_ref, o_ref, *, inv_count, eps):
    # Stats finalization replicated per tile: 8 channels, ~free on VPU/EUP,
    # removes the XLA glue dispatches between the two pallas_calls.
    tot = jnp.sum(psum_ref[...], axis=0)            # [Cout, 1]
    tot_sq = jnp.sum(psq_ref[...], axis=0)          # [Cout, 1]
    mean = tot * inv_count
    # TODO(synk): E[y^2]-E[y]^2 can cancel for activations with a large DC
    # offset; switch to a pivoted/Welford accumulation if that ever happens.
    var = jnp.maximum(tot_sq * inv_count - mean * mean, 0.0)   # biased (training)
    inv = jax.lax.rsqrt(var + eps)
    scale = gamma_ref[...] * inv                    # [Cout, 1]
    shift = beta_ref[...] - mean * scale            # [Cout, 1]

    y = y_ref[...].astype(jnp.float32)              # [Cout, tj]
    yhat = y * scale + shift
    z = yhat * jax.nn.sigmoid(yhat)                 # SiLU
    # deploy: sigmoid on w-indices >= 4.  Padded columns get finite garbage and
    # are sliced off outside (padding-must-be-benign invariant).
    o_ref[...] = jnp.where(mask_ref[...] > 0.5, jax.nn.sigmoid(z), z)


def deploy_cbs_forward(x_nchw, weight, gamma, beta, *, stride, eps=1e-3,
                       sig_start=4, tm=1024):
    """weight: [Cout, Cin, k, k] (PyTorch OIHW).  Returns NCHW output (f32)."""
    N, Cin, H, W = x_nchw.shape
    Cout, _, k, _ = weight.shape
    p = (k - 1) // 2
    OH = (H + 2 * p - k) // stride + 1
    OW = (W + 2 * p - k) // stride + 1
    ohow = OH * OW
    M = N * ohow
    K = k * k * Cin

    # Per-image j tile (128-lane axis).  Keep total grid >= 2 steps where
    # possible so v7x's 2 TensorCores are both fed; N >= 2 already covers it.
    tj_cap = _round_up(ohow, 128)
    if N == 1 and ohow > 128:
        tj_cap = _round_up(-(-ohow // 2), 128)
    tj = min(_round_up(tm, 128), tj_cap)
    ohow_p = _round_up(ohow, tj)
    grid_j = ohow_p // tj
    num_tiles = N * grid_j

    # ---- glue: im2col in bf16, per-image layout A^T: [N, K, ohow_p] ----------
    # TODO(synk): for large shapes do this in-kernel (halo DMA + k*k shifted
    # accumulating matmuls) to avoid the k*k HBM expansion.
    xp = jnp.pad(x_nchw.astype(jnp.bfloat16), ((0, 0), (0, 0), (p, p), (p, p)))
    rows = []
    for kh in range(k):
        for kw in range(k):
            sl = xp[:, :, kh:kh + (OH - 1) * stride + 1:stride,
                          kw:kw + (OW - 1) * stride + 1:stride]      # [N,Cin,OH,OW]
            rows.append(sl.reshape(N, Cin, ohow))
    aT = jnp.concatenate(rows, axis=1)                               # [N, K, ohow]
    if ohow_p != ohow:
        aT = jnp.pad(aT, ((0, 0), (0, 0), (0, ohow_p - ohow)))       # zero cols

    # OIHW -> (Cout, kh, kw, Cin) -> [Cout, K], matching the A^T row order.
    wT = jnp.transpose(weight, (0, 2, 3, 1)).reshape(Cout, K).astype(jnp.bfloat16)

    cparams = pltpu.CompilerParams(
        dimension_semantics=("parallel", "parallel"),
        vmem_limit_bytes=32 * 1024 * 1024)   # tiny tiles; safe on v7x's 64 MiB

    # ---- Pallas kernel 1: tiled conv matmul + partial batch stats ------------
    y, psum, psq = pl.pallas_call(
        _conv_stats_kernel,
        grid=(N, grid_j),
        in_specs=[
            pl.BlockSpec((None, K, tj), lambda n, j: (n, 0, j)),
            pl.BlockSpec((Cout, K), lambda n, j: (0, 0)),
        ],
        out_specs=(
            pl.BlockSpec((None, Cout, tj), lambda n, j: (n, 0, j)),
            pl.BlockSpec((None, Cout, 1), lambda n, j: (n * grid_j + j, 0, 0)),
            pl.BlockSpec((None, Cout, 1), lambda n, j: (n * grid_j + j, 0, 0)),
        ),
        out_shape=(
            jax.ShapeDtypeStruct((N, Cout, ohow_p), jnp.bfloat16),
            jax.ShapeDtypeStruct((num_tiles, Cout, 1), jnp.float32),
            jax.ShapeDtypeStruct((num_tiles, Cout, 1), jnp.float32),
        ),
        compiler_params=cparams,
    )(aT, wT)

    # Tiny constant inputs for kernel 2 (stats finalize happens inside it).
    g2 = gamma.astype(jnp.float32).reshape(Cout, 1)
    b2 = beta.astype(jnp.float32).reshape(Cout, 1)
    cols = jnp.arange(ohow_p, dtype=jnp.int32)
    deploy_mask = ((cols % OW) >= sig_start).astype(jnp.float32).reshape(1, ohow_p)

    # ---- Pallas kernel 2: BN normalize + SiLU + deploy sigmoid slice ---------
    out3d = pl.pallas_call(
        functools.partial(_bn_silu_deploy_kernel, inv_count=1.0 / M, eps=eps),
        grid=(N, grid_j),
        in_specs=[
            pl.BlockSpec((None, Cout, tj), lambda n, j: (n, 0, j)),
            pl.BlockSpec((num_tiles, Cout, 1), lambda n, j: (0, 0, 0)),
            pl.BlockSpec((num_tiles, Cout, 1), lambda n, j: (0, 0, 0)),
            pl.BlockSpec((Cout, 1), lambda n, j: (0, 0)),
            pl.BlockSpec((Cout, 1), lambda n, j: (0, 0)),
            pl.BlockSpec((1, tj), lambda n, j: (0, j)),
        ],
        out_specs=pl.BlockSpec((None, Cout, tj), lambda n, j: (n, 0, j)),
        out_shape=jax.ShapeDtypeStruct((N, Cout, ohow_p), jnp.float32),
        compiler_params=cparams,
    )(y, psum, psq, g2, b2, deploy_mask)

    # NCHW already; drop only the lane padding (free reshape, no transpose).
    return out3d[:, :, :ohow].reshape(N, Cout, OH, OW)


def _reference(x_nchw, weight, gamma, beta, *, stride, eps=1e-3, sig_start=4):
    k = weight.shape[2]
    p = (k - 1) // 2
    y = jax.lax.conv_general_dilated(
        x_nchw.astype(jnp.float32), weight.astype(jnp.float32),
        window_strides=(stride, stride), padding=[(p, p), (p, p)],
        dimension_numbers=("NCHW", "OIHW", "NCHW"))
    mean = y.mean(axis=(0, 2, 3), keepdims=True)
    var = y.var(axis=(0, 2, 3), keepdims=True)          # biased, training-mode BN
    yhat = (y - mean) * jax.lax.rsqrt(var + eps)
    yhat = yhat * gamma[None, :, None, None] + beta[None, :, None, None]
    z = yhat * jax.nn.sigmoid(yhat)                      # SiLU (cbs output)
    # deploy: x[..., 4:] = sigmoid(x[..., 4:])  (last dim of NCHW = W)
    return z.at[..., sig_start:].set(jax.nn.sigmoid(z[..., sig_start:]))


if __name__ == "__main__":
    # Module: deploy(model=cbs(in_=4, out_=8, kernel_size=3, stride=s))
    configs = [
        # (N, Cin, H, W, Cout, k, stride)
        (2, 4, 16, 16, 8, 3, 1),   # canonical small shape
        (2, 4, 20, 20, 8, 3, 1),   # padded (zero) lane columns
        (2, 4, 20, 20, 8, 3, 2),   # strided conv, OW=10 deploy slice
    ]
    key = jax.random.PRNGKey(0)
    for (N, Cin, H, W, Cout, k, stride) in configs:
        key, kx, kw, kg, kb = jax.random.split(key, 5)
        x = jax.random.normal(kx, (N, Cin, H, W), dtype=jnp.float32)
        weight = 0.1 * jax.random.normal(kw, (Cout, Cin, k, k), dtype=jnp.float32)
        gamma = 1.0 + 0.1 * jax.random.normal(kg, (Cout,), dtype=jnp.float32)
        beta = 0.1 * jax.random.normal(kb, (Cout,), dtype=jnp.float32)

        out = deploy_cbs_forward(x, weight, gamma, beta, stride=stride, eps=1e-3)
        out = jax.block_until_ready(out)

        ref = _reference(x, weight, gamma, beta, stride=stride, eps=1e-3)
        p = (k - 1) // 2
        OH = (H + 2 * p - k) // stride + 1
        OW = (W + 2 * p - k) // stride + 1
        assert out.shape == (N, Cout, OH, OW)
        # Tolerance covers the intentional bf16 MXU operands / bf16 intermediate
        # y (f32 accumulation, f32 BN stats); observed error is ~1e-3 level.
        assert jnp.allclose(out, ref, atol=2e-2, rtol=2e-2), (
            float(jnp.max(jnp.abs(out - ref))))

    print("KERNEL_OK")
</pallas_src>

<mosaic_0001>
module attributes {stable_mosaic.version = 11 : i64} {
  func.func @_conv_stats_kernel(%arg0: i32, %arg1: i32, %arg2: memref<1x36x256xbf16, #tpu.memory_space<vmem>>, %arg3: memref<8x36xbf16, #tpu.memory_space<vmem>>, %arg4: memref<1x8x256xbf16, #tpu.memory_space<vmem>>, %arg5: memref<1x8x1xf32, #tpu.memory_space<vmem>>, %arg6: memref<1x8x1xf32, #tpu.memory_space<vmem>>) attributes {dimension_semantics = [#tpu.dimension_semantics<parallel>, #tpu.dimension_semantics<parallel>], iteration_bounds = array<i64: 2, 1>, scalar_prefetch = 0 : i64, scratch_operands = 0 : i64, tpu.core_type = #tpu.core_type<tc>, window_params = [{transform_indices = @transform_0, window_bounds = array<i64: 1, 36, 256>}, {pipeline_mode = #tpu.pipeline_mode<synchronous>, transform_indices = @transform_1, window_bounds = array<i64: 8, 36>}, {transform_indices = @transform_2, window_bounds = array<i64: 1, 8, 256>}, {transform_indices = @transform_3, window_bounds = array<i64: 1, 8, 1>}, {transform_indices = @transform_4, window_bounds = array<i64: 1, 8, 1>}]} {
    %c0 = arith.constant 0 : index
    %c0_0 = arith.constant 0 : index
    %0 = vector.load %arg3[%c0, %c0_0] : memref<8x36xbf16, #tpu.memory_space<vmem>>, vector<8x36xbf16>
    %c0_1 = arith.constant 0 : index
    %c0_2 = arith.constant 0 : index
    %c0_3 = arith.constant 0 : index
    %1 = vector.load %arg2[%c0_1, %c0_2, %c0_3] : memref<1x36x256xbf16, #tpu.memory_space<vmem>>, vector<1x36x256xbf16>
    %2 = vector.shape_cast %1 : vector<1x36x256xbf16> to vector<36x256xbf16>
    %cst = arith.constant dense<0.000000e+00> : vector<8x256xf32>
    %3 = tpu.matmul %0, %2, %cst {dimension_numbers = #tpu.dot_dimension_numbers<[1], [0], [0], [1], [0, 0, 1, 1], [], []>} : vector<8x36xbf16>, vector<36x256xbf16>, vector<8x256xf32> -> vector<8x256xf32>
    %cst_4 = arith.constant dense<0.000000e+00> : vector<8xf32>
    %4 = vector.multi_reduction <add>, %3, %cst_4 [1] : vector<8x256xf32> to vector<8xf32>
    %5 = vector.shape_cast %4 : vector<8xf32> to vector<8x1xf32>
    %c0_5 = arith.constant 0 : index
    %c0_6 = arith.constant 0 : index
    %c0_7 = arith.constant 0 : index
    %6 = vector.load %arg5[%c0_5, %c0_6, %c0_7] : memref<1x8x1xf32, #tpu.memory_space<vmem>>, vector<1x8x1xf32>
    %7 = vector.shape_cast %6 : vector<1x8x1xf32> to vector<8x1xf32>
    %8 = vector.shape_cast %5 : vector<8x1xf32> to vector<1x8x1xf32>
    tpu.vector_store %arg5[%c0_5, %c0_6, %c0_7], %8 {strides = array<i32>} : memref<1x8x1xf32, #tpu.memory_space<vmem>>, vector<1x8x1xf32>,
    %9 = arith.mulf %3, %3 : vector<8x256xf32>
    %cst_8 = arith.constant dense<0.000000e+00> : vector<8xf32>
    %10 = vector.multi_reduction <add>, %9, %cst_8 [1] : vector<8x256xf32> to vector<8xf32>
    %11 = vector.shape_cast %10 : vector<8xf32> to vector<8x1xf32>
    %c0_9 = arith.constant 0 : index
    %c0_10 = arith.constant 0 : index
    %c0_11 = arith.constant 0 : index
    %12 = vector.load %arg6[%c0_9, %c0_10, %c0_11] : memref<1x8x1xf32, #tpu.memory_space<vmem>>, vector<1x8x1xf32>
    %13 = vector.shape_cast %12 : vector<1x8x1xf32> to vector<8x1xf32>
    %14 = vector.shape_cast %11 : vector<8x1xf32> to vector<1x8x1xf32>
    tpu.vector_store %arg6[%c0_9, %c0_10, %c0_11], %14 {strides = array<i32>} : memref<1x8x1xf32, #tpu.memory_space<vmem>>, vector<1x8x1xf32>,
    %15 = arith.truncf %3 : vector<8x256xf32> to vector<8x256xbf16>
    %c0_12 = arith.constant 0 : index
    %c0_13 = arith.constant 0 : index
    %c0_14 = arith.constant 0 : index
    %16 = vector.load %arg4[%c0_12, %c0_13, %c0_14] : memref<1x8x256xbf16, #tpu.memory_space<vmem>>, vector<1x8x256xbf16>
    %17 = vector.shape_cast %16 : vector<1x8x256xbf16> to vector<8x256xbf16>
    %18 = vector.shape_cast %15 : vector<8x256xbf16> to vector<1x8x256xbf16>
    tpu.vector_store %arg4[%c0_12, %c0_13, %c0_14], %18 {strides = array<i32>} : memref<1x8x256xbf16, #tpu.memory_space<vmem>>, vector<1x8x256xbf16>,
    return
  }
  func.func @transform_0(%arg0: i32, %arg1: i32) -> (i32, i32, i32) {
    %c0_i32 = arith.constant 0 : i32
    %c0_i32_0 = arith.constant 0 : i32
    return %arg0, %c0_i32, %arg1 : i32, i32, i32
  }
  func.func @transform_1(%arg0: i32, %arg1: i32) -> (i32, i32) {
    %c0_i32 = arith.constant 0 : i32
    %c0_i32_0 = arith.constant 0 : i32
    %c0_i32_1 = arith.constant 0 : i32
    return %c0_i32, %c0_i32_0 : i32, i32
  }
  func.func @transform_2(%arg0: i32, %arg1: i32) -> (i32, i32, i32) {
    %c0_i32 = arith.constant 0 : i32
    %c0_i32_0 = arith.constant 0 : i32
    return %arg0, %c0_i32, %arg1 : i32, i32, i32
  }
  func.func @transform_3(%arg0: i32, %arg1: i32) -> (i32, i32, i32) {
    %c1_i32 = arith.constant 1 : i32
    %0 = arith.muli %arg0, %c1_i32 : i32
    %1 = arith.addi %0, %arg1 : i32
    %c0_i32 = arith.constant 0 : i32
    %c0_i32_0 = arith.constant 0 : i32
    %c0_i32_1 = arith.constant 0 : i32
    return %1, %c0_i32, %c0_i32_0 : i32, i32, i32
  }
  func.func @transform_4(%arg0: i32, %arg1: i32) -> (i32, i32, i32) {
    %c1_i32 = arith.constant 1 : i32
    %0 = arith.muli %arg0, %c1_i32 : i32
    %1 = arith.addi %0, %arg1 : i32
    %c0_i32 = arith.constant 0 : i32
    %c0_i32_0 = arith.constant 0 : i32
    %c0_i32_1 = arith.constant 0 : i32
    return %1, %c0_i32, %c0_i32_0 : i32, i32, i32
  }
}

</mosaic_0001>

<bundles_post_ra>
// kernel: tpu_custom_call.1
= control target key start
LH: loop header
LB: loop body
LE: loop exit
PB: predicated region body
PF: predicated region fallthrough
CT: control target
= control target key end

     0   :  { %10 = vsyncpa [#allocation3], 0  ;;  %s811_s0 = inlined_call_operand.vmem [shape: bf16[2,36,256], index: 0, kind: input, shape index: {}]   ;;  %s812_s1 = inlined_call_operand.vmem [shape: bf16[8,36], index: 1, kind: input, shape index: {}]   ;;  %s813_s2 = inlined_call_operand.hbm [shape: bf16[2,8,256], index: 2, kind: output, shape index: {0}]   ;;  %s814_s3 = inlined_call_operand.vmem [shape: f32[2,8,1], index: 3, kind: output, shape index: {1}]   ;;  %s815_s4 = inlined_call_operand.vmem [shape: f32[2,8,1], index: 4, kind: output, shape index: {2}]  }
   0x1   :  { %12 = vsyncpa [#allocation3 + $0x1], 0  ;;  %s701_s15 = smov 0   ;;  %s703_s16 = smov 0  }
   0x2   :  { %s705_s17 = smov 0   ;;  %s707_s18 = smov 0  }
   0x3   :  { %s709_s19 = smov 0   ;;  %s711_s20 = smov 0  }
   0x4 LB: > { %s503_s21 = sadd.s32 4294967295, %s674_s20   ;;  %s504_s22 = sadd.s32 4294967294, %s674_s20   ;;  %s674_s20 = sphi %s711_s20, %s18_s20   ;;  %s670_s19 = sphi %s709_s19, %s822_s19   ;;  %s666_s18 = sphi %s707_s18, %s821_s18   ;;  %s662_s17 = sphi %s705_s17, %s820_s17   ;;  %s658_s16 = sphi %s703_s16, %s819_s16   ;;  %s654_s15 = sphi %s701_s15, %s818_s15  }
   0x5   : > { %s30_s23 = sadd.s32 1, %s670_s19  ;;  %s88_s24 = sadd.s32 1, %s662_s17 }
   0x6   : > { %p32_p0 = scmp.ge.s32.totalorder %s30_s23, 2  ;;  %p98_p1 = scmp.ne.s32.totalorder %s662_s17, %s658_s16 }
   0x7   : > { %p99_p2 = scmp.eq.s32.totalorder %s503_s21, 1  ;;  %p104_p3 = scmp.ne.s32.totalorder %s658_s16, %s654_s15 }
   0x8   : > { %s824_s23 = smov (%p32_p0, %s30_s23), 0  ;;  %p105_p5 = scmp.eq.s32.totalorder %s504_s22, 1 }
   0x9   : > { %p741_p4 = por %p99_p2, %p98_p1  ;;  %s83_s26 = ssub.s32 %s670_s19, %s824_s23 }
   0xa   : > { %p507_p6 = scmp.ge.s32.totalorder %s674_s20, 1  ;;  %p86_p7 = scmp.eq.s32.totalorder %s83_s26, 0 }
   0xb   : > { %p748_p8 = por %p105_p5, %p104_p3  ;;  %p195_p9 = scmp.lt.s32.totalorder %s674_s20, 3 }
   0xc   : > { %s754_s28 = scalar_select %p86_p7, %s662_s17, %s88_s24  }
   0xd   : > { %p196_p10 = pnand %p507_p6, %p195_p9 }
   0xe   : > { %p236_p11 = scmp.lt.s32.totalorder (!%p196_p10), %s666_s18, 1  ;;  %s218_s10 = sand.u32 (!%p196_p10), 1, %s658_s16  }
   0xf   : > { %199 = sbr.rel (%p196_p10) target bundleno = 295 (0x127), region = 28  ;;  %s508_s11 = sshll.u32 (!%p196_p10), %s218_s10, 3 }
  0x10   : > { %s539_s12 = sshll.u32 (!%p196_p10), %s666_s18, 3  ;;  %s220_s22 = scalar_lea.vmem (!%p196_p10), [#allocation2], %s508_s11 }
  0x11   : > { %s364_s21 = scalar_lea.hbm (!%p196_p10), %s813_s2, %s539_s12  ;;  %s366_s24 = sshll.u32 (!%p196_p10), %s220_s22, 4  ;;  %s367_s24 = int_to_ptr.vmem [resolvable:$true] %s366_s24 }
  0x12   : > { %s368_s26 = sshll.u32 (!%p196_p10), %s364_s21, 4  ;;  %s616_s8 = scalar_lea.hbm (!%p196_p10), %s813_s2, 16  ;;  %s369_s26 = int_to_ptr.hbm [resolvable:$true] %s368_s26 }
  0x13   : > { %s610_s5 = sshra.s32 (!%p196_p10), %s369_s26, 4  ;;  %s611_s5 = int_to_ptr.hbm [resolvable:$true] %s610_s5 }
  0x14   : > { %s758_s29 = scalar_select %p236_p11, %s666_s18, 1  ;;  %vm294_vm0 = vcmask 1041408   ;;  %v259_v19 = vld [vmem:[%s812_s1] sm:$0xf]  ;;  %vm290_vm1 = vcmask 293888  }
  0x15   : > { %s612_s18 = scalar_lea.hbm %s611_s5, 8  ;;  %p617_p1 = scmp.lt.s32.totalorder %s611_s5, %s813_s2 }
  0x16   : > { %s540_s30 = smul.u32 40, %s758_s29  ;;  %p613_p12 = scmp.ne.s32.totalorder %s611_s5, %s612_s18 }
  0x17   : > { %p618_p2 = scmp.lt.s32.totalorder %s616_s8, %s612_s18 }
  0x18   : > { %s243_s7 = scalar_lea.vmem %s811_s0, %s540_s30  ;;  %s341_s30 = scalar_lea.sflag [#allocation3], %s218_s10 }
  0x19   : > { %v264_v0 = vld [vmem:[%s243_s7 + $0x20] sm:$0x33]  ;;  %v522_v3 = vld [vmem:[%s243_s7 + $0x10] sm:$0xf]  ;;  %v538_v6 = vld [vmem:[%s243_s7 + $0x14] sm:$0xf0]  ;;  %p614_p13 = pnand %p613_p12, %p741_p4  ;;  %p619_p3 = por %p618_p2, %p617_p1 }
  0x1a   : > { %v278_v1 = vunpack.c.l.b16 %v264_v0  ;;  %v279_v2 = vunpack.c.h.b16 %v264_v0  ;;  %v537_v7 = vld [vmem:[%s243_s7 + $0x14] sm:$0xf]  ;;  %v524_v8 = vld [vmem:[%s243_s7 + $0x18] sm:$0xf0]  ;;  %v523_v11 = vor.u32 %v538_v6, %v522_v3  ;;  %v514_v13 = vld [vmem:[%s243_s7] sm:$0xf] }
  0x1b   : > { %v527_v12 = vor.u32 %v537_v7, %v524_v8  ;;  %v536_v14 = vld [vmem:[%s243_s7 + $0x4] sm:$0xf0]  ;;  %v535_v15 = vld [vmem:[%s243_s7 + $0x4] sm:$0xf]  ;;  %v516_v16 = vld [vmem:[%s243_s7 + $0x8] sm:$0xf0]  ;;  %p615_p0 = pneg %p614_p13 }
  0x1c   : > { %v284_v4 = vpack.c.b16 %v278_v1, %v278_v1  ;;  %v285_v5 = vpack.c.b16 %v279_v2, %v279_v2  ;;  %v515_v17 = vor.u32 %v536_v14, %v514_v13  ;;  %v519_v18 = vor.u32 %v535_v15, %v516_v16 }
  0x1d   : > { %p620_p5 = pnand %p619_p3, %p615_p0 }
  0x1e   : > { %v296_v9 = vsel %vm294_vm0, %v284_v4, 0  ;;  %v299_v10 = vsel %vm294_vm0, %v285_v5, 0 }
  0x1f   : > { %306 = vmatpush.bf16.msra.mxu0 %v296_v9  ;;  %319 = vmatpush.bf16.msra.mxu1 %v299_v10 }
  0x23   : > { %307 = vmatpush.bf16.msra.mxu0 %v523_v11  ;;  %320 = vmatpush.bf16.msra.mxu1 %v527_v12 }
  0x27   : > { %308 = vmatpush.bf16.msra.mxu0 %v515_v17  ;;  %321 = vmatpush.bf16.msra.mxu1 %v519_v18 }
  0x2a   : > { %528 = vmatmul.msk.bf16.vlgmr.msra.gmra.mxu0 %vm290_vm1, %v259_v19  ;;  %529 = vmatmul.msk.bf16.vlgmr.msra.gmra.mxu1 %vm290_vm1, %v259_v19 }
  0xa7   : > { %v310_v20 = vpop.f32.mrf.mxu0  ;;  %v323_v21 = vpop.f32.mrf.mxu1 }
  0xa8   : > { %v338_v22 = vpack.c.bf16 %v323_v21, %v310_v20  ;;  %v327_v23 = vadd.f32 %v323_v21, %v310_v20 }
  0xaa   : > { %328 = vadd.xlane.f32.xlu0 %v327_v23  ;;  %339 = vst [vmem:[%s220_s22] sm:$0xff] %v338_v22 }
  0xab   : > { %623 = shalt.err (!%p620_p5)
}
  0xac   : > { %541 = dma.vmem_to_hbm [thread:$0]  (%p741_p4), %s367_s24, 128, %s369_s26, %s341_s30   ;;  %v332_v24 = vmul.f32 %v310_v20, %v310_v20  ;;  %v333_v25 = vmul.f32 %v323_v21, %v323_v21  ;;  %vm330_vm2 = vcmask 7168  }
  0xad   : > { %s510_s10 = sshll.u32 %s758_s29, 3 }
  0xae   : > { %v334_v28 = vadd.f32 %v333_v25, %v332_v24  ;;  %s250_s14 = scalar_lea.vmem %s814_s3, %s510_s10  ;;  %s256_s25 = scalar_lea.vmem %s815_s4, %s510_s10 }
  0xaf   : > { %v312_v26 = vpop.f32.mrf.mxu0  ;;  %v325_v27 = vpop.f32.mrf.mxu1 }
  0xb2   : > { %335 = vadd.xlane.f32.xlu0 %v334_v28 }
 0x11d   : > { %v329_v29 = vpop.xlane.xlu0 %328 }
 0x11e   : > { %331 = vst.msk [vmem:[%s250_s14] sm:$0xff] %vm330_vm2, %v329_v29 }
 0x125   : > { %v336_v30 = vpop.xlane.xlu0 %335 }
 0x126   : > { %337 = vst.msk [vmem:[%s256_s25] sm:$0xff] %vm330_vm2, %v336_v30 }
 0x127 PF: > { %p547_p4 = scmp.ge.s32.totalorder %s674_s20, 2  ;;  %s388_s24 = sand.u32 1, %s654_s15  }
 0x128   : > { %s389_s29 = scalar_lea.sflag [#allocation3], %s388_s24 }
 0x129   : > { %p544_p6 = pnand %p547_p4, %p748_p8 }
 0x12b   : > { %p545_p7 = pneg %p544_p6 }
 0x12d   : > { %649 = dma.done.wait (%p545_p7), %s389_s29, 128  }
 0x12e   : > { %651 = vsyncadd (%p545_p7), %s389_s29, 4294967168  ;;  %s18_s20 = sadd.s32 1, %s674_s20   ;;  %s818_s15 = smov %s658_s16 }
 0x12f   : > { %p15_p9 = scmp.ge.s32.totalorder %s18_s20, 4   ;;  %s819_s16 = smov %s662_s17 }
 0x130   : > { %s820_s17 = smov %s754_s28  ;;  %s821_s18 = smov %s670_s19 }
 0x131   : > { %s822_s19 = smov %s824_s23  ;;  %17 = sbr.rel (!%p15_p9) target bundleno = 4 (0x4), region = 87 }
 0x136   :  { %411 = vsyncpa [#allocation3], 1 }
 0x137   :  { %413 = vsyncpa [#allocation3 + $0x1], 1 }

</bundles_post_ra>
